<compile_context>
chip_gen: v7x
topology: tpu7x:2x2x1
jax: 0.10.0
libtpu: 0.0.40
codegen_flags: <defaults>
</compile_context>

<pallas_src>
import functools

import jax
import jax.numpy as jnp
from jax.experimental import pallas as pl
from jax.experimental.pallas import tpu as pltpu


def _round_up(n: int, m: int) -> int:
    return (n + m - 1) // m * m


def mlp_kernel(xt_ref, w1t_ref, b1_ref, w2t_ref, b2_ref, qt_ref, at_ref):
    # Hidden layer: (H, IN) @ (IN, TB) -> (H, TB). bf16 MXU matmul, f32 accumulate.
    h = jnp.dot(w1t_ref[...], xt_ref[...], preferred_element_type=jnp.float32)
    h = jnp.maximum(h + b1_ref[...], 0.0)                        # bias + ReLU (VPU)

    # Output layer: (A, H) @ (H, TB) -> (A, TB). Activations recast to bf16 for MXU.
    q = jnp.dot(w2t_ref[...], h.astype(jnp.bfloat16),
                preferred_element_type=jnp.float32) + b2_ref[...]
    qt_ref[...] = q.astype(qt_ref.dtype)                          # lane-dense store

    # Fused greedy action selection: argmax over the (small) action axis with
    # first-max-index semantics.  Implemented with f32 max/min sublane
    # reductions + iota/select (robust Mosaic lowering; no argmax primitive).
    n_act = q.shape[0]
    row = jax.lax.broadcasted_iota(jnp.int32, q.shape, 0).astype(jnp.float32)
    qmax = jnp.max(q, axis=0, keepdims=True)
    idx = jnp.min(jnp.where(q >= qmax, row, float(n_act)), axis=0, keepdims=True)
    at_ref[...] = idx.astype(at_ref.dtype)                        # (1, TB) int32


def prepare_params(w1, b1, w2, b2):
    """One-time layout/dtype prep — hoist this out of any training/eval loop so
    the bf16 casts & transposes are not re-executed per forward call."""
    return dict(
        w1t=jnp.asarray(w1, jnp.float32).T.astype(jnp.bfloat16),   # (H, IN) bf16
        b1c=jnp.asarray(b1, jnp.float32).reshape(-1, 1),            # (H, 1)  f32
        w2t=jnp.asarray(w2, jnp.float32).T.astype(jnp.bfloat16),   # (A, H)  bf16
        b2c=jnp.asarray(b2, jnp.float32).reshape(-1, 1),            # (A, 1)  f32
    )


@functools.partial(jax.jit, static_argnames=("block_b",))
def net_forward(x, params, *, block_b=1024):
    """Forward pass.  Returns (q_values [B, A] f32, greedy_actions [B] int32)."""
    x = jnp.asarray(x, jnp.float32)
    B, IN = x.shape
    A = params["w2t"].shape[0]

    # Batch tiling: a single tile when the batch is small, otherwise 128-aligned
    # tiles so the lane constraint holds across a multi-step (megacore-shardable)
    # grid.  Batch is padded with zero rows; they are sliced off below.
    if B <= block_b:
        TB = _round_up(B, 8)
    else:
        TB = _round_up(block_b, 128)
    Bp = _round_up(B, TB)

    xp = jnp.pad(x, ((0, Bp - B), (0, 0)))
    xt = xp.T.astype(jnp.bfloat16)                                  # (IN, Bp), batch on lanes

    qt, at = pl.pallas_call(
        mlp_kernel,
        out_shape=(jax.ShapeDtypeStruct((A, Bp), jnp.float32),
                   jax.ShapeDtypeStruct((1, Bp), jnp.int32)),
        grid=(Bp // TB,),
        in_specs=[
            pl.BlockSpec((IN, TB), lambda i: (0, i)),               # x^T tile
            pl.BlockSpec(params["w1t"].shape, lambda i: (0, 0)),    # resident weights
            pl.BlockSpec(params["b1c"].shape, lambda i: (0, 0)),
            pl.BlockSpec(params["w2t"].shape, lambda i: (0, 0)),
            pl.BlockSpec(params["b2c"].shape, lambda i: (0, 0)),
        ],
        out_specs=(pl.BlockSpec((A, TB), lambda i: (0, i)),         # Q^T tile
                   pl.BlockSpec((1, TB), lambda i: (0, i))),        # actions tile
        compiler_params=pltpu.CompilerParams(
            dimension_semantics=("parallel",)),                     # megacore on v7x
    )(xt, params["w1t"], params["b1c"], params["w2t"], params["b2c"])

    q = qt.T[:B]           # back to PyTorch (B, A) orientation
    actions = at[0, :B]    # (B,) int32 greedy actions (== Net.action per row)
    return q, actions


def init_params(key, in_features=4, hidden=64, n_actions=2):
    """Deterministic PyTorch-Linear-style init: U(-1/sqrt(fan_in), 1/sqrt(fan_in))."""
    k1, k2, k3, k4 = jax.random.split(key, 4)
    bound1 = 1.0 / jnp.sqrt(float(in_features))
    bound2 = 1.0 / jnp.sqrt(float(hidden))
    w1 = jax.random.uniform(k1, (in_features, hidden), jnp.float32, -bound1, bound1)
    b1 = jax.random.uniform(k2, (hidden,), jnp.float32, -bound1, bound1)
    w2 = jax.random.uniform(k3, (hidden, n_actions), jnp.float32, -bound2, bound2)
    b2 = jax.random.uniform(k4, (n_actions,), jnp.float32, -bound2, bound2)
    return w1, b1, w2, b2


def _reference_q(x, w1, b1, w2, b2):
    """bf16-faithful reference (matches the kernel's numerics: bf16 inputs to
    each matmul, f32 accumulation)."""
    def bf(v):
        return v.astype(jnp.bfloat16).astype(jnp.float32)
    h = jnp.maximum(bf(x) @ bf(w1) + b1[None, :], 0.0)
    return bf(h) @ bf(w2) + b2[None, :]


if __name__ == "__main__":
    key = jax.random.PRNGKey(0)
    k_params, k_x, k_x2 = jax.random.split(key, 3)

    # CartPole: observation_space.shape = (4,), action_space.n = 2.
    B, IN, H, A = 8, 4, 64, 2
    w1, b1, w2, b2 = init_params(k_params, IN, H, A)
    params = prepare_params(w1, b1, w2, b2)

    # --- small inference-style batch (single tile) ---
    x = jax.random.normal(k_x, (B, IN), jnp.float32)
    q, actions = net_forward(x, params)
    jax.block_until_ready((q, actions))

    q_ref = _reference_q(x, w1, b1, w2, b2)
    assert q.shape == (B, A) and actions.shape == (B,)
    assert jnp.allclose(q, q_ref, atol=1e-3, rtol=1e-3)
    assert jnp.array_equal(actions, jnp.argmax(q, axis=1).astype(jnp.int32))

    # --- replay-batch-style path (multi-tile batch grid + padding) ---
    B2 = 300
    x2 = jax.random.normal(k_x2, (B2, IN), jnp.float32)
    q2, actions2 = net_forward(x2, params, block_b=128)
    jax.block_until_ready((q2, actions2))

    q2_ref = _reference_q(x2, w1, b1, w2, b2)
    assert q2.shape == (B2, A) and actions2.shape == (B2,)
    assert jnp.allclose(q2, q2_ref, atol=1e-3, rtol=1e-3)
    assert jnp.array_equal(actions2, jnp.argmax(q2, axis=1).astype(jnp.int32))

    print("KERNEL_OK")
</pallas_src>

<mosaic_0001>
module attributes {stable_mosaic.version = 11 : i64} {
  func.func @mlp_kernel(%arg0: i32, %arg1: memref<4x8xbf16, #tpu.memory_space<vmem>>, %arg2: memref<64x4xbf16, #tpu.memory_space<vmem>>, %arg3: memref<64x1xf32, #tpu.memory_space<vmem>>, %arg4: memref<2x64xbf16, #tpu.memory_space<vmem>>, %arg5: memref<2x1xf32, #tpu.memory_space<vmem>>, %arg6: memref<2x8xf32, #tpu.memory_space<vmem>>, %arg7: memref<1x8xi32, #tpu.memory_space<vmem>>) attributes {dimension_semantics = [#tpu.dimension_semantics<parallel>], iteration_bounds = array<i64: 1>, scalar_prefetch = 0 : i64, scratch_operands = 0 : i64, tpu.core_type = #tpu.core_type<tc>, window_params = [{transform_indices = @transform_0, window_bounds = array<i64: 4, 8>}, {pipeline_mode = #tpu.pipeline_mode<synchronous>, transform_indices = @transform_1, window_bounds = array<i64: 64, 4>}, {pipeline_mode = #tpu.pipeline_mode<synchronous>, transform_indices = @transform_2, window_bounds = array<i64: 64, 1>}, {pipeline_mode = #tpu.pipeline_mode<synchronous>, transform_indices = @transform_3, window_bounds = array<i64: 2, 64>}, {pipeline_mode = #tpu.pipeline_mode<synchronous>, transform_indices = @transform_4, window_bounds = array<i64: 2, 1>}, {transform_indices = @transform_5, window_bounds = array<i64: 2, 8>}, {transform_indices = @transform_6, window_bounds = array<i64: 1, 8>}]} {
    %c0 = arith.constant 0 : index
    %c0_0 = arith.constant 0 : index
    %0 = vector.load %arg2[%c0, %c0_0] : memref<64x4xbf16, #tpu.memory_space<vmem>>, vector<64x4xbf16>
    %c0_1 = arith.constant 0 : index
    %c0_2 = arith.constant 0 : index
    %1 = vector.load %arg1[%c0_1, %c0_2] : memref<4x8xbf16, #tpu.memory_space<vmem>>, vector<4x8xbf16>
    %cst = arith.constant dense<0.000000e+00> : vector<64x8xf32>
    %2 = tpu.matmul %0, %1, %cst {dimension_numbers = #tpu.dot_dimension_numbers<[1], [0], [0], [1], [0, 0, 1, 1], [], []>} : vector<64x4xbf16>, vector<4x8xbf16>, vector<64x8xf32> -> vector<64x8xf32>
    %c0_3 = arith.constant 0 : index
    %c0_4 = arith.constant 0 : index
    %3 = vector.load %arg3[%c0_3, %c0_4] : memref<64x1xf32, #tpu.memory_space<vmem>>, vector<64x1xf32>
    %4 = vector.broadcast %3 : vector<64x1xf32> to vector<64x8xf32>
    %5 = arith.addf %2, %4 : vector<64x8xf32>
    %cst_5 = arith.constant 0.000000e+00 : f32
    %6 = vector.broadcast %cst_5 : f32 to vector<64x8xf32>
    %7 = arith.maximumf %5, %6 : vector<64x8xf32>
    %c0_6 = arith.constant 0 : index
    %c0_7 = arith.constant 0 : index
    %8 = vector.load %arg4[%c0_6, %c0_7] : memref<2x64xbf16, #tpu.memory_space<vmem>>, vector<2x64xbf16>
    %9 = arith.truncf %7 : vector<64x8xf32> to vector<64x8xbf16>
    %cst_8 = arith.constant dense<0.000000e+00> : vector<2x8xf32>
    %10 = tpu.matmul %8, %9, %cst_8 {dimension_numbers = #tpu.dot_dimension_numbers<[1], [0], [0], [1], [0, 0, 1, 1], [], []>} : vector<2x64xbf16>, vector<64x8xbf16>, vector<2x8xf32> -> vector<2x8xf32>
    %c0_9 = arith.constant 0 : index
    %c0_10 = arith.constant 0 : index
    %11 = vector.load %arg5[%c0_9, %c0_10] : memref<2x1xf32, #tpu.memory_space<vmem>>, vector<2x1xf32>
    %12 = vector.broadcast %11 : vector<2x1xf32> to vector<2x8xf32>
    %13 = arith.addf %10, %12 : vector<2x8xf32>
    %c0_11 = arith.constant 0 : index
    %c0_12 = arith.constant 0 : index
    %14 = vector.load %arg6[%c0_11, %c0_12] : memref<2x8xf32, #tpu.memory_space<vmem>>, vector<2x8xf32>
    tpu.vector_store %arg6[%c0_11, %c0_12], %13 {strides = array<i32>} : memref<2x8xf32, #tpu.memory_space<vmem>>, vector<2x8xf32>,
    %15 = tpu.iota {dimensions = array<i32: 0>} : vector<2x8xi32>
    %16 = arith.sitofp %15 : vector<2x8xi32> to vector<2x8xf32>
    %cst_13 = arith.constant dense<0xFF800000> : vector<8xf32>
    %17 = vector.multi_reduction <maximumf>, %13, %cst_13 [0] : vector<2x8xf32> to vector<8xf32>
    %18 = vector.shape_cast %17 : vector<8xf32> to vector<1x8xf32>
    %19 = vector.broadcast %18 : vector<1x8xf32> to vector<2x8xf32>
    %20 = arith.cmpf oge, %13, %19 : vector<2x8xf32>
    %cst_14 = arith.constant 2.000000e+00 : f32
    %21 = vector.broadcast %cst_14 : f32 to vector<2x8xf32>
    %22 = arith.select %20, %16, %21 : vector<2x8xi1>, vector<2x8xf32>
    %cst_15 = arith.constant dense<0x7F800000> : vector<8xf32>
    %23 = vector.multi_reduction <minimumf>, %22, %cst_15 [0] : vector<2x8xf32> to vector<8xf32>
    %24 = vector.shape_cast %23 : vector<8xf32> to vector<1x8xf32>
    %25 = arith.fptosi %24 : vector<1x8xf32> to vector<1x8xi32>
    %c0_16 = arith.constant 0 : index
    %c0_17 = arith.constant 0 : index
    %26 = vector.load %arg7[%c0_16, %c0_17] : memref<1x8xi32, #tpu.memory_space<vmem>>, vector<1x8xi32>
    tpu.vector_store %arg7[%c0_16, %c0_17], %25 {strides = array<i32>} : memref<1x8xi32, #tpu.memory_space<vmem>>, vector<1x8xi32>,
    return
  }
  func.func @transform_0(%arg0: i32) -> (i32, i32) {
    %c0_i32 = arith.constant 0 : i32
    %c0_i32_0 = arith.constant 0 : i32
    return %c0_i32, %arg0 : i32, i32
  }
  func.func @transform_1(%arg0: i32) -> (i32, i32) {
    %c0_i32 = arith.constant 0 : i32
    %c0_i32_0 = arith.constant 0 : i32
    %c0_i32_1 = arith.constant 0 : i32
    return %c0_i32, %c0_i32_0 : i32, i32
  }
  func.func @transform_2(%arg0: i32) -> (i32, i32) {
    %c0_i32 = arith.constant 0 : i32
    %c0_i32_0 = arith.constant 0 : i32
    %c0_i32_1 = arith.constant 0 : i32
    return %c0_i32, %c0_i32_0 : i32, i32
  }
  func.func @transform_3(%arg0: i32) -> (i32, i32) {
    %c0_i32 = arith.constant 0 : i32
    %c0_i32_0 = arith.constant 0 : i32
    %c0_i32_1 = arith.constant 0 : i32
    return %c0_i32, %c0_i32_0 : i32, i32
  }
  func.func @transform_4(%arg0: i32) -> (i32, i32) {
    %c0_i32 = arith.constant 0 : i32
    %c0_i32_0 = arith.constant 0 : i32
    %c0_i32_1 = arith.constant 0 : i32
    return %c0_i32, %c0_i32_0 : i32, i32
  }
  func.func @transform_5(%arg0: i32) -> (i32, i32) {
    %c0_i32 = arith.constant 0 : i32
    %c0_i32_0 = arith.constant 0 : i32
    return %c0_i32, %arg0 : i32, i32
  }
  func.func @transform_6(%arg0: i32) -> (i32, i32) {
    %c0_i32 = arith.constant 0 : i32
    %c0_i32_0 = arith.constant 0 : i32
    return %c0_i32, %arg0 : i32, i32
  }
}

</mosaic_0001>

<bundles_post_ra>
// kernel: net_forward.1
= control target key start
LH: loop header
LB: loop body
LE: loop exit
PB: predicated region body
PF: predicated region fallthrough
CT: control target
= control target key end

     0   :  { %12 = vsyncpa [#allocation3], 0  ;;  %vm115_vm0 = vcmask 1041408   ;;  %vm102_vm1 = vcmask 31744   ;;  %v402_v5 = vmov 0   ;;  %s518_s0 = inlined_call_operand.vmem [shape: bf16[4,8], index: 0, kind: input, shape index: {}]   ;;  %s519_s1 = inlined_call_operand.vmem [shape: bf16[64,4], index: 1, kind: input, shape index: {}]   ;;  %s520_s2 = inlined_call_operand.vmem [shape: f32[64,1], index: 2, kind: input, shape index: {}]   ;;  %s521_s3 = inlined_call_operand.vmem [shape: bf16[2,64], index: 3, kind: input, shape index: {}]   ;;  %s522_s4 = inlined_call_operand.vmem [shape: f32[2,1], index: 4, kind: input, shape index: {}]   ;;  %s523_s5 = inlined_call_operand.hbm [shape: f32[2,8], index: 5, kind: output, shape index: {0}]   ;;  %s524_s6 = inlined_call_operand.hbm [shape: s32[1,8], index: 6, kind: output, shape index: {1}]  }
   0x1   :  { %v33_v0 = vld [vmem:[%s518_s0] sm:$0x3]  ;;  %v351_v3 = vld [vmem:[%s519_s1 + $0x8] sm:$0xff]   ;;  %v352_v4 = vld [vmem:[%s519_s1 + $0x10] sm:$0xff]   ;;  %348 = vset.pattern.permute.xlu0 %v402_v5  ;;  %349 = vset.pattern.permute.xlu1 %v402_v5 }
   0x2   :  { %v350_v1 = vld [vmem:[%s519_s1] sm:$0xff]   ;;  %340 = vmatprep.subr.msk.bf16.mxu0 %vm115_vm0, %v33_v0  ;;  %v117_v2 = vsel %vm115_vm0, %v33_v0, 0  ;;  %v36_v7 = vld [vmem:[%s520_s2 + $0x10] sm:$0xff]  ;;  %v35_v8 = vld [vmem:[%s520_s2 + $0x8] sm:$0xff] }
   0x3   :  { %319 = vmatpush3.bf16.msra.mxu0 %v117_v2  ;;  %320 = vmatprep.mubr.msk.bf16.mxu0 %vm102_vm1, %v350_v1  ;;  %v34_v6 = vld [vmem:[%s520_s2] sm:$0xff]  ;;  %v37_v9 = vld [vmem:[%s520_s2 + $0x18] sm:$0xff] }
   0x4   :  { %44 = vperm.xlu0 %348, %v34_v6   ;;  %54 = vperm.xlu1 %349, %v36_v7  }
   0x6   :  { %321 = vmatmul.mubr.msk.bf16.vlgmr.msra.gmra.mrb[0].mxu0 %vm102_vm1, %v351_v3 }
   0x7   :  { %324 = vmatprep.mubr.msk.bf16.mxu0 %vm102_vm1, %v352_v4 }
   0x8   :  { %13 = vsyncpa [#allocation5], 0  ;;  %v353_v10 = vld [vmem:[%s519_s1 + $0x18] sm:$0xff]   ;;  %49 = vperm.xlu0 %348, %v35_v8   ;;  %v38_v11 = vld [vmem:[%s520_s2 + $0x20] sm:$0xff]  ;;  %59 = vperm.xlu1 %349, %v37_v9   ;;  %v403_v16 = vmov 0.0   ;;  %vm404_vm2 = vmmov 0  }
   0x9   :  { %v39_v12 = vld [vmem:[%s520_s2 + $0x28] sm:$0xff]  ;;  %v40_v13 = vld [vmem:[%s520_s2 + $0x30] sm:$0xff]  ;;  %v41_v14 = vld [vmem:[%s520_s2 + $0x38] sm:$0xff]  ;;  %328 = vmatprep.subr.bf16.mxu1 %v403_v16  ;;  %336 = vmatprep.mubr.msk.bf16.mxu1 %vm404_vm2, %v403_v16  ;;  %vm203_vm3 = vcmask 523264   ;;  %s405_s23 = smov [#allocation2]   ;;  %vm247_vm4 = vcmask 58368  }
   0xa   :  { %v197_v15 = vld [vmem:[%s522_s4] sm:$0x3]  ;;  %s277_s24 = sshll.u32 %s405_s23, 4  ;;  %s278_s24 = int_to_ptr.vmem [resolvable:$true] %s277_s24 }
   0xb   :  { %v192_v53 = vld [vmem:[%s521_s3] sm:$0x1]  ;;  %s354_s25 = scalar_lea.vmem %s278_s24, 32  ;;  %p359_p1 = scmp.lt.s32.totalorder %s278_s24, %s278_s24 }
   0xc   :  { %64 = vperm.xlu0 %348, %v38_v11   ;;  %69 = vperm.xlu1 %349, %v39_v12   ;;  %p355_p0 = scmp.ne.s32.totalorder %s278_s24, %s354_s25  ;;  %p360_p2 = scmp.lt.s32.totalorder %s354_s25, %s354_s25 }
   0xe   :  { %325 = vmatmul.mubr.msk.bf16.gmra.mrb[4].mxu0 %vm102_vm1, %v353_v10  ;;  %p361_p3 = por %p360_p2, %p359_p1 }
  0x10   :  { %74 = vperm.xlu0 %348, %v40_v13   ;;  %79 = vperm.xlu1 %349, %v41_v14   ;;  %p362_p4 = pnand %p361_p3, %p355_p0 }
  0x14   :  { %200 = vperm.xlu0 %348, %v197_v15  }
  0x83   :  { %v45_v17 = vpop.permute.xlu0 %44  ;;  %v55_v18 = vpop.permute.xlu1 %54 }
  0x87   :  { %v50_v19 = vpop.permute.xlu0 %49  ;;  %v60_v20 = vpop.permute.xlu1 %59 }
  0x8b   :  { %v65_v24 = vpop.permute.xlu0 %64  ;;  %v70_v29 = vpop.permute.xlu1 %69 }
  0x8f   :  { %v75_v36 = vpop.permute.xlu0 %74  ;;  %v80_v41 = vpop.permute.xlu1 %79 }
  0x93   :  { %v201_v54 = vpop.permute.xlu0 %200 }
  0xd9   :  { %v322_v21 = vpop.f32.mrb[0].mxu0 }
  0xda   :  { %v162_v22 = vadd.f32 %v322_v21, %v55_v18  ;;  %v153_v23 = vpop.f32.mrb[1].mxu0 }
  0xdb   :  { %v154_v25 = vadd.f32 %v153_v23, %v45_v17  ;;  %v323_v26 = vpop.f32.mrb[2].mxu0 }
  0xdc   :  { %v165_v27 = vadd.f32 %v323_v26, %v60_v20  ;;  %v156_v28 = vpop.f32.mrb[3].mxu0  ;;  %v186_v31 = vmax.f32 %v162_v22, 0.0 }
  0xdd   :  { %v157_v30 = vadd.f32 %v156_v28, %v50_v19  ;;  %v184_v33 = vmax.f32 %v154_v25, 0.0 }
  0xde   :  { %v187_v32 = vmax.f32 %v165_v27, 0.0 }
  0xdf   :  { %v185_v34 = vmax.f32 %v157_v30, 0.0 }
  0xe0   :  { %v194_v35 = vpack.c.bf16 %v187_v32, %v186_v31 }
  0xe1   :  { %v326_v37 = vpop.f32.mrb[4].mxu0  ;;  %v193_v38 = vpack.c.bf16 %v185_v34, %v184_v33 }
  0xe2   :  { %v178_v39 = vadd.f32 %v326_v37, %v75_v36  ;;  %v169_v40 = vpop.f32.mrb[5].mxu0 }
  0xe3   :  { %v170_v42 = vadd.f32 %v169_v40, %v65_v24  ;;  %v327_v43 = vpop.f32.mrb[6].mxu0  ;;  %329 = vmatpush3.bf16.msra.mxu1 %v193_v38 }
  0xe4   :  { %v181_v44 = vadd.f32 %v327_v43, %v80_v41  ;;  %v172_v45 = vpop.f32.mrb[7].mxu0  ;;  %330 = vmatprep.subr.bf16.mxu1 %v403_v16  ;;  %v190_v47 = vmax.f32 %v178_v39, 0.0 }
  0xe5   :  { %v173_v46 = vadd.f32 %v172_v45, %v70_v29  ;;  %v188_v49 = vmax.f32 %v170_v42, 0.0 }
  0xe6   :  { %v191_v48 = vmax.f32 %v181_v44, 0.0 }
  0xe7   :  { %v189_v50 = vmax.f32 %v173_v46, 0.0  ;;  %331 = vmatpush3.bf16.msra.mxu1 %v194_v35 }
  0xe8   :  { %v196_v51 = vpack.c.bf16 %v191_v48, %v190_v47  ;;  %332 = vmatprep.subr.bf16.mxu1 %v403_v16 }
  0xe9   :  { %v195_v52 = vpack.c.bf16 %v189_v50, %v188_v49 }
  0xeb   :  { %333 = vmatpush3.bf16.msra.mxu1 %v195_v52 }
  0xec   :  { %334 = vmatprep.subr.bf16.mxu1 %v403_v16 }
  0xef   :  { %335 = vmatpush3.bf16.msra.mxu1 %v196_v51 }
  0xf2   :  { %337 = vmatmul.mubr.msk.bf16.vlgmr.msra.gmra.mrb[0].mxu1 %vm203_vm3, %v192_v53 }
 0x1c5   :  { %v241_v55 = vpop.f32.mrb[0].mxu1 }
 0x1c6   :  { %v242_v56 = vadd.f32 %v241_v55, %v201_v54  ;;  %v338_v57 = vpop.f32.mrb[1].mxu1 }
 0x1c7   :  { %v244_v58 = vpop.f32.mrb[2].mxu1 }
 0x1c8   :  { %v339_v59 = vpop.f32.mrb[3].mxu1  ;;  %248 = vst.msk [vmem:[#allocation2] sm:$0x3] %vm247_vm4, %v242_v56  ;;  %v252_v60 = vsel %vm247_vm4, %v242_v56, -inf }
 0x1c9   :  { %v253_v61 = vrot.slane %v252_v60, 4 }
 0x1ca   :  { %365 = shalt.err (!%p362_p4)
}
 0x1cb   :  { %s366_s27 = scalar_lea.hbm %s523_s5, 32 }
 0x1cc   :  { %p367_p5 = scmp.ne.s32.totalorder %s523_s5, %s366_s27  ;;  %p370_p6 = scmp.lt.u32.totalorder %s366_s27, %s523_s5 }
 0x1ce   :  { %p372_p7 = pnand %p370_p6, %p367_p5 }
 0x1d0   :  { %375 = shalt.err (!%p372_p7)
}
 0x1d1   :  { %280 = dma.vmem_to_hbm [thread:$0]  %s278_s24, 32, %s523_s5, [#allocation3]   ;;  %v249_v62 = vlaneseq  ;;  %v254_v63 = vmax.f32 %v252_v60, %v253_v61  ;;  %vm269_vm6 = vcmask 57344  }
 0x1d2   :  { %s406_s9 = smov [#allocation4]  }
 0x1d3   :  { %v255_v0 = vrot.slane %v254_v63, 2  ;;  %v250_v1 = vshrl.u32 %v249_v62, 7  ;;  %s287_s5 = sshll.u32 %s406_s9, 4  ;;  %s288_s5 = int_to_ptr.vmem [resolvable:$true] %s287_s5 }
 0x1d4   :  { %s376_s10 = scalar_lea.vmem %s288_s5, 16  ;;  %s380_s11 = scalar_lea.vmem %s288_s5, 32 }
 0x1d5   :  { %v256_v2 = vmax.f32 %v254_v63, %v255_v0  ;;  %v251_v4 = vcvt.s32.f32 %v250_v1  ;;  %p377_p8 = scmp.ne.s32.totalorder %s288_s5, %s376_s10  ;;  %p381_p9 = scmp.lt.s32.totalorder %s288_s5, %s288_s5 }
 0x1d6   :  { %p382_p10 = scmp.lt.s32.totalorder %s380_s11, %s376_s10 }
 0x1d7   :  { %v257_v3 = vrot.slane %v256_v2, 1 }
 0x1d8   :  { %p383_p11 = por %p382_p10, %p381_p9 }
 0x1d9   :  { %v258_v5 = vmax.f32 %v256_v2, %v257_v3 }
 0x1da   :  { %p384_p12 = pnand %p383_p11, %p377_p8 }
 0x1db   :  { %vm259_vm5 = vcmp.ge.f32.partialorder %v242_v56, %v258_v5 }
 0x1dc   :  { %v260_v6 = vsel %vm259_vm5, %v251_v4, 2.0 }
 0x1dd   :  { %v261_v7 = vsel %vm247_vm4, %v260_v6, inf }
 0x1de   :  { %v262_v8 = vrot.slane %v261_v7, 4 }
 0x1e0   :  { %v263_v9 = vmin.f32 %v261_v7, %v262_v8 }
 0x1e2   :  { %v264_v10 = vrot.slane %v263_v9, 2 }
 0x1e4   :  { %v265_v11 = vmin.f32 %v263_v9, %v264_v10 }
 0x1e6   :  { %v266_v12 = vrot.slane %v265_v11, 1 }
 0x1e8   :  { %v267_v13 = vmin.f32 %v265_v11, %v266_v12 }
 0x1ea   :  { %v341_v14 = vtrunc.f32 %v267_v13 }
 0x1ec   :  { %v342_v15 = vcvt.f32.s32 %v341_v14 }
 0x1ee   :  { %270 = vst.msk [vmem:[#allocation4] sm:$0x1] %vm269_vm6, %v342_v15 }
 0x1ef   :  { %387 = shalt.err (!%p384_p12)
}
 0x1f0   :  { %s388_s14 = scalar_lea.hbm %s524_s6, 16 }
 0x1f1   :  { %p389_p13 = scmp.ne.s32.totalorder %s524_s6, %s388_s14  ;;  %p392_p0 = scmp.lt.u32.totalorder %s388_s14, %s524_s6 }
 0x1f3   :  { %p394_p1 = pnand %p392_p0, %p389_p13 }
 0x1f5   :  { %397 = shalt.err (!%p394_p1)
}
 0x1f6   :  { %290 = dma.vmem_to_hbm [thread:$0]  %s288_s5, 16, %s524_s6, [#allocation5]  }
 0x1f7   :  { %398 = dma.done.wait [#allocation3], 32  }
 0x1f8   :  { %399 = vsyncadd [#allocation3], 4294967264 }
 0x1f9   :  { %400 = dma.done.wait [#allocation5], 16  }
 0x1fa   :  { %401 = vsyncadd [#allocation5], 4294967280 }
 0x1fb   :  { %297 = vsyncpa [#allocation3], 1 }
 0x1fc   :  { %298 = vsyncpa [#allocation5], 1 }

</bundles_post_ra>
